<compile_context>
chip_gen: v7x
topology: tpu7x:2x2x1
jax: 0.10.0
libtpu: 0.0.40
codegen_flags: <defaults>
</compile_context>

<pallas_src>
import functools

import jax
import jax.numpy as jnp
from jax import lax
from jax.experimental import pallas as pl
from jax.experimental.pallas import tpu as pltpu

EPS = 1e-5

_VMEM = pl.BlockSpec(memory_space=pltpu.MemorySpace.VMEM)
# 32 MiB is safe on every generation (v7x scoped default); raise on v5e/v6e if
# B*L grows enough to need it.
_COMPILER_PARAMS = pltpu.CompilerParams(vmem_limit_bytes=32 * 1024 * 1024)


# ---------------------------------------------------------------------------
# Kernel 1: fused conv encoder (batched over lanes, single block).
# Output (B, 40, T2) == PyTorch's contiguous `combined` tensor (post BN+ReLU),
# so `.view(-1, 40)` outside is a free reshape.
# ---------------------------------------------------------------------------
def enc_conv_kernel(x0_ref, x1_ref, x2_ref, w1e_ref, w2e_ref, vec_ref, out_ref,
                    *, batch, seq):
    B, L = batch, seq
    T1, T2 = L - 4, L - 6
    W1 = B * L - 4          # conv1 width over the flattened signal (with overhang)
    W2 = B * L - 6          # conv2 width over the flattened signal (with overhang)
    f32 = jnp.float32

    vec = vec_ref[...]                      # (40, 4) packed BN params
    g1, be1 = vec[0:32, 0:1], vec[0:32, 1:2]   # BN1 gamma/beta (rows 30,31 = 0)
    g2, be2 = vec[:, 2:3], vec[:, 3:4]         # BN2 gamma/beta

    xs = (x0_ref[...], x1_ref[...], x2_ref[...])    # each (1, B*L): speed, sin, cos

    # ---- conv1: im2col (15, W1) -> single MXU matmul (32, W1) ----
    # row s*5+k of p1 is signal s shifted by tap k; w1e is block "diagonal"
    # (rows 30,31 zero) so the 3 independent Conv1d(1,10,k=5) become one dot.
    p1 = jnp.concatenate(
        [xs[s][:, k:k + W1] for s in range(3) for k in range(5)], axis=0)
    y1 = jnp.dot(w1e_ref[...], p1, preferred_element_type=f32)       # (32, W1)

    # zero the positions whose 5-tap window straddles a batch boundary so they
    # do not pollute the BatchNorm statistics (they never feed a valid output)
    pos1 = lax.broadcasted_iota(jnp.int32, (1, W1), 1)
    y1 = jnp.where(lax.rem(pos1, L) < T1, y1, 0.0)

    # ---- BatchNorm1 (training-mode batch stats, biased var) + ReLU ----
    n1 = float(B * T1)
    mean1 = jnp.sum(y1, axis=1, keepdims=True) / n1
    var1 = jnp.maximum(jnp.sum(y1 * y1, axis=1, keepdims=True) / n1
                       - mean1 * mean1, 0.0)
    scale1 = g1 * lax.rsqrt(var1 + EPS)
    y1n = jnp.maximum(y1 * scale1 + (be1 - mean1 * scale1), 0.0)      # (32, W1)
    # pad rows 30,31: zero weights/gamma/beta -> stay exactly 0 through BN+ReLU

    # ---- conv2: im2col (96, W2) (sublane-aligned groups of 32) -> one matmul
    p2 = jnp.concatenate([y1n[:, k:k + W2] for k in range(3)], axis=0)  # (96, W2)
    y2 = jnp.dot(w2e_ref[...], p2, preferred_element_type=f32)          # (40, W2)

    pos2 = lax.broadcasted_iota(jnp.int32, (1, W2), 1)
    y2 = jnp.where(lax.rem(pos2, L) < T2, y2, 0.0)

    # ---- BatchNorm2 + ReLU ----
    n2 = float(B * T2)
    mean2 = jnp.sum(y2, axis=1, keepdims=True) / n2
    var2 = jnp.maximum(jnp.sum(y2 * y2, axis=1, keepdims=True) / n2
                       - mean2 * mean2, 0.0)
    scale2 = g2 * lax.rsqrt(var2 + EPS)
    y2n = jnp.maximum(y2 * scale2 + (be2 - mean2 * scale2), 0.0)        # (40, W2)

    # ---- emit PyTorch-contiguous (B, 40, T2): drop the overhang columns ----
    # TODO(synk): these are B narrow (lane-width T2) stores; for very large B a
    # lane-dense output layout would be faster but would re-add XLA transpose
    # glue before the .view(-1, 40).
    for b in range(B):
        out_ref[b] = y2n[:, b * L:b * L + T2]


# ---------------------------------------------------------------------------
# Kernel 2: fused head  (enc_fc -> out_bn -> speed decoder).
# ---------------------------------------------------------------------------
def head_kernel(x_ref, wfct_ref, hvec_ref, enc_ref, spd_ref):
    m = x_ref.shape[0]
    hv = hvec_ref[...]                      # (4, 40)
    g, be = hv[0:1, :], hv[1:2, :]          # out_bn gamma / beta
    wd = hv[2:3, :]                         # decoder weight row
    bd = hv[3:4, 0:1]                       # decoder bias

    x = x_ref[...]                          # (M, 40)
    # enc_fc (bias cancels in out_bn); weight pre-transposed at pack time.
    h = jnp.dot(x, wfct_ref[...], preferred_element_type=jnp.float32)  # (M, 40)

    inv_m = 1.0 / float(m)
    mean = jnp.sum(h, axis=0, keepdims=True) * inv_m
    var = jnp.maximum(jnp.sum(h * h, axis=0, keepdims=True) * inv_m
                      - mean * mean, 0.0)
    scale = g * lax.rsqrt(var + EPS)
    enc = (h - mean) * scale + be
    enc_ref[...] = enc
    # decoder (40 -> 1): elementwise multiply + lane reduction.
    spd_ref[...] = jnp.sum(enc * wd, axis=1, keepdims=True) + bd


# ---------------------------------------------------------------------------
# pallas_call wrappers
# ---------------------------------------------------------------------------
def _enc_conv(x0, x1, x2, w1e, w2e, bn_vec, batch, seq):
    kernel = functools.partial(enc_conv_kernel, batch=batch, seq=seq)
    return pl.pallas_call(
        kernel,
        out_shape=jax.ShapeDtypeStruct((batch, 40, seq - 6), jnp.float32),
        in_specs=[_VMEM] * 6,
        out_specs=_VMEM,
        compiler_params=_COMPILER_PARAMS,
    )(x0, x1, x2, w1e, w2e, bn_vec)


def _head(flat, wfc_t, head_vec):
    m = flat.shape[0]
    return pl.pallas_call(
        head_kernel,
        out_shape=(jax.ShapeDtypeStruct((m, 40), jnp.float32),
                   jax.ShapeDtypeStruct((m, 1), jnp.float32)),
        in_specs=[_VMEM] * 3,
        out_specs=(_VMEM, _VMEM),
        compiler_params=_COMPILER_PARAMS,
    )(flat, wfc_t, head_vec)


# ---------------------------------------------------------------------------
# Parameters (deterministic init, PyTorch shapes)
# ---------------------------------------------------------------------------
def init_params(key):
    ks = jax.random.split(key, 22)
    u = lambda k, s, sc: jax.random.uniform(k, s, jnp.float32, -sc, sc)
    bw = lambda k, s: jax.random.uniform(k, s, jnp.float32, 0.5, 1.5)   # BN weight
    bb = lambda k, s: jax.random.uniform(k, s, jnp.float32, -0.2, 0.2)  # BN bias
    p = {}
    p['speed_c1_w'] = u(ks[0], (10, 1, 5), 0.44); p['speed_c1_b'] = u(ks[1], (10,), 0.44)
    p['sin_c1_w']   = u(ks[2], (10, 1, 5), 0.44); p['sin_c1_b']   = u(ks[3], (10,), 0.44)
    p['cos_c1_w']   = u(ks[4], (10, 1, 5), 0.44); p['cos_c1_b']   = u(ks[5], (10,), 0.44)
    p['speed_bn1_w'] = bw(ks[6], (10,));  p['speed_bn1_b'] = bb(ks[7], (10,))
    p['sin_bn1_w']   = bw(ks[8], (10,));  p['sin_bn1_b']   = bb(ks[9], (10,))
    p['cos_bn1_w']   = bw(ks[10], (10,)); p['cos_bn1_b']   = bb(ks[11], (10,))
    p['combined_c_w'] = u(ks[12], (40, 30, 3), 0.105); p['combined_c_b'] = u(ks[13], (40,), 0.105)
    p['combined_bn_w'] = bw(ks[14], (40,)); p['combined_bn_b'] = bb(ks[15], (40,))
    p['enc_fc_w'] = u(ks[16], (40, 40), 0.158); p['enc_fc_b'] = u(ks[17], (40,), 0.158)
    p['out_bn_w'] = bw(ks[18], (40,)); p['out_bn_b'] = bb(ks[19], (40,))
    p['speed_dec_w'] = u(ks[20], (1, 40), 0.158); p['speed_dec_b'] = u(ks[21], (1,), 0.158)
    return p


def pack_params(p):
    """One-time packing of kernel operands (kept out of the per-step hot path).

    Conv / FC biases that precede a training-mode BatchNorm are intentionally
    not packed: the BN mean subtraction cancels them exactly.
    """
    f32 = jnp.float32

    # conv1 block weight (32, 15): row s*10+c, col s*5+k; rows 30,31 zero.
    w1e = jnp.zeros((32, 15), f32)
    for s, name in enumerate(('speed_c1_w', 'sin_c1_w', 'cos_c1_w')):
        w1e = w1e.at[s * 10:(s + 1) * 10, s * 5:(s + 1) * 5].set(p[name][:, 0, :])

    # conv2 weight (40, 96): col k*32 + c (channel groups padded 30 -> 32).
    w2e = jnp.zeros((40, 96), f32)
    for k in range(3):
        w2e = w2e.at[:, k * 32:k * 32 + 30].set(p['combined_c_w'][:, :, k])

    g1 = jnp.concatenate([p['speed_bn1_w'], p['sin_bn1_w'], p['cos_bn1_w']])
    be1 = jnp.concatenate([p['speed_bn1_b'], p['sin_bn1_b'], p['cos_bn1_b']])

    def col(v):
        return jnp.pad(v, (0, 40 - v.shape[0])).reshape(40, 1)

    bn_vec = jnp.concatenate(
        [col(g1), col(be1), col(p['combined_bn_w']), col(p['combined_bn_b'])],
        axis=1)                                                  # (40, 4)

    head_vec = jnp.stack(
        [p['out_bn_w'], p['out_bn_b'], p['speed_dec_w'][0],
         jnp.broadcast_to(p['speed_dec_b'], (40,))], axis=0)     # (4, 40)

    return {'w1e': w1e, 'w2e': w2e, 'bn_vec': bn_vec,
            'wfc_t': p['enc_fc_w'].T, 'head_vec': head_vec}


# ---------------------------------------------------------------------------
# Forward pass
# ---------------------------------------------------------------------------
@functools.partial(jax.jit, static_argnames=("return_enc",))
def traj_model_forward(packed, speed, sin, cos, return_enc=False):
    B, _, L = speed.shape
    # (B, 1, L) -> (1, B*L): contiguous, free reshapes.
    x0 = speed.reshape(1, B * L)
    x1 = sin.reshape(1, B * L)
    x2 = cos.reshape(1, B * L)

    combined = _enc_conv(x0, x1, x2, packed['w1e'], packed['w2e'],
                         packed['bn_vec'], B, L)                 # (B, 40, T2)

    # Exact PyTorch `combined.view(-1, 40)` (channel/time interleave quirk):
    # free reshape of the contiguous channel-major tensor.
    flat = combined.reshape(-1, 40)                              # (B*T2, 40)

    enc, spd = _head(flat, packed['wfc_t'], packed['head_vec'])

    pred = {'speed': spd}
    if return_enc:
        return enc, pred
    return pred


# ---------------------------------------------------------------------------
# Pure-JAX reference (literal translation of the PyTorch module, f32)
# ---------------------------------------------------------------------------
def reference_forward(params, speed, sin, cos):
    def conv1d(x, w, b):
        K = w.shape[-1]
        T = x.shape[-1] - K + 1
        xw = jnp.stack([x[:, :, k:k + T] for k in range(K)], axis=-1)  # (B,Ci,T,K)
        return jnp.einsum('bctk,ock->bot', xw, w) + b[None, :, None]

    def bn_ncl(x, g, b):      # BatchNorm1d on (B, C, T), training-mode stats
        mean = x.mean(axis=(0, 2), keepdims=True)
        var = ((x - mean) ** 2).mean(axis=(0, 2), keepdims=True)
        return (x - mean) * lax.rsqrt(var + EPS) * g[None, :, None] + b[None, :, None]

    def bn_nc(x, g, b):       # BatchNorm1d on (M, C)
        mean = x.mean(axis=0, keepdims=True)
        var = ((x - mean) ** 2).mean(axis=0, keepdims=True)
        return (x - mean) * lax.rsqrt(var + EPS) * g[None, :] + b[None, :]

    relu = lambda v: jnp.maximum(v, 0.0)
    s = relu(bn_ncl(conv1d(speed, params['speed_c1_w'], params['speed_c1_b']),
                    params['speed_bn1_w'], params['speed_bn1_b']))
    si = relu(bn_ncl(conv1d(sin, params['sin_c1_w'], params['sin_c1_b']),
                     params['sin_bn1_w'], params['sin_bn1_b']))
    c = relu(bn_ncl(conv1d(cos, params['cos_c1_w'], params['cos_c1_b']),
                    params['cos_bn1_w'], params['cos_bn1_b']))
    comb = jnp.concatenate([s, si, c], axis=1)
    comb = relu(bn_ncl(conv1d(comb, params['combined_c_w'], params['combined_c_b']),
                       params['combined_bn_w'], params['combined_bn_b']))
    flat = comb.reshape(-1, 40)
    out = flat @ params['enc_fc_w'].T + params['enc_fc_b']
    enc = bn_nc(out, params['out_bn_w'], params['out_bn_b'])
    spd = enc @ params['speed_dec_w'].T + params['speed_dec_b']
    return enc, spd


# ---------------------------------------------------------------------------
if __name__ == "__main__":
    key = jax.random.PRNGKey(0)
    pkey, dkey = jax.random.split(key)
    params = init_params(pkey)
    packed = pack_params(params)

    B, L = 2, 16                     # seq=16 -> T1=12 -> T2=10
    k1, k2, k3 = jax.random.split(dkey, 3)
    speed = jax.random.normal(k1, (B, 1, L), jnp.float32)
    sin = jax.random.normal(k2, (B, 1, L), jnp.float32)
    cos = jax.random.normal(k3, (B, 1, L), jnp.float32)

    enc, pred = traj_model_forward(packed, speed, sin, cos, return_enc=True)
    enc = jax.block_until_ready(enc)
    spd = jax.block_until_ready(pred['speed'])

    M = B * (L - 6)
    assert enc.shape == (M, 40), enc.shape
    assert spd.shape == (M, 1), spd.shape
    assert bool(jnp.all(jnp.isfinite(enc))) and bool(jnp.all(jnp.isfinite(spd)))

    # Cross-check against the pure-JAX reference of the PyTorch module.
    enc_ref, spd_ref = reference_forward(params, speed, sin, cos)
    assert bool(jnp.allclose(enc, enc_ref, atol=1e-2, rtol=1e-2)), \
        float(jnp.max(jnp.abs(enc - enc_ref)))
    assert bool(jnp.allclose(spd, spd_ref, atol=1e-2, rtol=1e-2)), \
        float(jnp.max(jnp.abs(spd - spd_ref)))

    # BatchNorm (training mode) invariants: per-feature mean == beta, std ~= |gamma|.
    col_mean = jnp.mean(enc, axis=0)
    col_std = jnp.sqrt(jnp.mean((enc - col_mean) ** 2, axis=0))
    assert bool(jnp.allclose(col_mean, params['out_bn_b'], atol=1e-3))
    assert bool(jnp.allclose(col_std, jnp.abs(params['out_bn_w']), atol=1e-2))

    print("KERNEL_OK")
</pallas_src>

<mosaic_0001>
module attributes {stable_mosaic.version = 11 : i64} {
  func.func @enc_conv_kernel(%arg0: memref<1x32xf32, #tpu.memory_space<vmem>>, %arg1: memref<1x32xf32, #tpu.memory_space<vmem>>, %arg2: memref<1x32xf32, #tpu.memory_space<vmem>>, %arg3: memref<32x15xf32, #tpu.memory_space<vmem>>, %arg4: memref<40x96xf32, #tpu.memory_space<vmem>>, %arg5: memref<40x4xf32, #tpu.memory_space<vmem>>, %arg6: memref<2x40x10xf32, #tpu.memory_space<vmem>>) attributes {dimension_semantics = [], scalar_prefetch = 0 : i64, scratch_operands = 0 : i64, tpu.core_type = #tpu.core_type<tc>} {
    %c0 = arith.constant 0 : index
    %c0_0 = arith.constant 0 : index
    %0 = vector.load %arg5[%c0, %c0_0] : memref<40x4xf32, #tpu.memory_space<vmem>>, vector<40x4xf32>
    %1 = vector.extract_strided_slice %0 {offsets = [0, 0], sizes = [32, 1], strides = [1, 1]} : vector<40x4xf32> to vector<32x1xf32>
    %2 = vector.extract_strided_slice %0 {offsets = [0, 1], sizes = [32, 1], strides = [1, 1]} : vector<40x4xf32> to vector<32x1xf32>
    %3 = vector.extract_strided_slice %0 {offsets = [0, 2], sizes = [40, 1], strides = [1, 1]} : vector<40x4xf32> to vector<40x1xf32>
    %4 = vector.extract_strided_slice %0 {offsets = [0, 3], sizes = [40, 1], strides = [1, 1]} : vector<40x4xf32> to vector<40x1xf32>
    %c0_1 = arith.constant 0 : index
    %c0_2 = arith.constant 0 : index
    %5 = vector.load %arg0[%c0_1, %c0_2] : memref<1x32xf32, #tpu.memory_space<vmem>>, vector<1x32xf32>
    %c0_3 = arith.constant 0 : index
    %c0_4 = arith.constant 0 : index
    %6 = vector.load %arg1[%c0_3, %c0_4] : memref<1x32xf32, #tpu.memory_space<vmem>>, vector<1x32xf32>
    %c0_5 = arith.constant 0 : index
    %c0_6 = arith.constant 0 : index
    %7 = vector.load %arg2[%c0_5, %c0_6] : memref<1x32xf32, #tpu.memory_space<vmem>>, vector<1x32xf32>
    %8 = vector.extract_strided_slice %5 {offsets = [0, 0], sizes = [1, 28], strides = [1, 1]} : vector<1x32xf32> to vector<1x28xf32>
    %9 = vector.extract_strided_slice %5 {offsets = [0, 1], sizes = [1, 28], strides = [1, 1]} : vector<1x32xf32> to vector<1x28xf32>
    %10 = vector.extract_strided_slice %5 {offsets = [0, 2], sizes = [1, 28], strides = [1, 1]} : vector<1x32xf32> to vector<1x28xf32>
    %11 = vector.extract_strided_slice %5 {offsets = [0, 3], sizes = [1, 28], strides = [1, 1]} : vector<1x32xf32> to vector<1x28xf32>
    %12 = vector.extract_strided_slice %5 {offsets = [0, 4], sizes = [1, 28], strides = [1, 1]} : vector<1x32xf32> to vector<1x28xf32>
    %13 = vector.extract_strided_slice %6 {offsets = [0, 0], sizes = [1, 28], strides = [1, 1]} : vector<1x32xf32> to vector<1x28xf32>
    %14 = vector.extract_strided_slice %6 {offsets = [0, 1], sizes = [1, 28], strides = [1, 1]} : vector<1x32xf32> to vector<1x28xf32>
    %15 = vector.extract_strided_slice %6 {offsets = [0, 2], sizes = [1, 28], strides = [1, 1]} : vector<1x32xf32> to vector<1x28xf32>
    %16 = vector.extract_strided_slice %6 {offsets = [0, 3], sizes = [1, 28], strides = [1, 1]} : vector<1x32xf32> to vector<1x28xf32>
    %17 = vector.extract_strided_slice %6 {offsets = [0, 4], sizes = [1, 28], strides = [1, 1]} : vector<1x32xf32> to vector<1x28xf32>
    %18 = vector.extract_strided_slice %7 {offsets = [0, 0], sizes = [1, 28], strides = [1, 1]} : vector<1x32xf32> to vector<1x28xf32>
    %19 = vector.extract_strided_slice %7 {offsets = [0, 1], sizes = [1, 28], strides = [1, 1]} : vector<1x32xf32> to vector<1x28xf32>
    %20 = vector.extract_strided_slice %7 {offsets = [0, 2], sizes = [1, 28], strides = [1, 1]} : vector<1x32xf32> to vector<1x28xf32>
    %21 = vector.extract_strided_slice %7 {offsets = [0, 3], sizes = [1, 28], strides = [1, 1]} : vector<1x32xf32> to vector<1x28xf32>
    %22 = vector.extract_strided_slice %7 {offsets = [0, 4], sizes = [1, 28], strides = [1, 1]} : vector<1x32xf32> to vector<1x28xf32>
    %23 = tpu.concatenate %8, %9, %10, %11, %12, %13, %14, %15, %16, %17, %18, %19, %20, %21, %22 in 0 : vector<1x28xf32>, vector<1x28xf32>, vector<1x28xf32>, vector<1x28xf32>, vector<1x28xf32>, vector<1x28xf32>, vector<1x28xf32>, vector<1x28xf32>, vector<1x28xf32>, vector<1x28xf32>, vector<1x28xf32>, vector<1x28xf32>, vector<1x28xf32>, vector<1x28xf32>, vector<1x28xf32> -> vector<15x28xf32>
    %c0_7 = arith.constant 0 : index
    %c0_8 = arith.constant 0 : index
    %24 = vector.load %arg3[%c0_7, %c0_8] : memref<32x15xf32, #tpu.memory_space<vmem>>, vector<32x15xf32>
    %cst = arith.constant dense<0.000000e+00> : vector<32x28xf32>
    %25 = tpu.matmul %24, %23, %cst {dimension_numbers = #tpu.dot_dimension_numbers<[1], [0], [0], [1], [0, 0, 1, 1], [], []>} : vector<32x15xf32>, vector<15x28xf32>, vector<32x28xf32> -> vector<32x28xf32>
    %26 = tpu.iota {dimensions = array<i32: 1>} : vector<1x28xi32>
    %c16_i32 = arith.constant 16 : i32
    %27 = vector.broadcast %c16_i32 : i32 to vector<1x28xi32>
    %28 = arith.remsi %26, %27 : vector<1x28xi32>
    %c12_i32 = arith.constant 12 : i32
    %29 = vector.broadcast %c12_i32 : i32 to vector<1x28xi32>
    %30 = arith.cmpi slt, %28, %29 : vector<1x28xi32>
    %cst_9 = arith.constant 0.000000e+00 : f32
    %31 = vector.shape_cast %30 : vector<1x28xi1> to vector<1x28xi1>
    %32 = vector.broadcast %31 : vector<1x28xi1> to vector<32x28xi1>
    %33 = vector.broadcast %cst_9 : f32 to vector<32x28xf32>
    %34 = arith.select %32, %25, %33 : vector<32x28xi1>, vector<32x28xf32>
    %cst_10 = arith.constant dense<0.000000e+00> : vector<32xf32>
    %35 = vector.multi_reduction <add>, %34, %cst_10 [1] : vector<32x28xf32> to vector<32xf32>
    %36 = vector.shape_cast %35 : vector<32xf32> to vector<32x1xf32>
    %cst_11 = arith.constant 2.400000e+01 : f32
    %37 = vector.broadcast %cst_11 : f32 to vector<32x1xf32>
    %38 = arith.divf %36, %37 : vector<32x1xf32>
    %39 = arith.mulf %34, %34 : vector<32x28xf32>
    %cst_12 = arith.constant dense<0.000000e+00> : vector<32xf32>
    %40 = vector.multi_reduction <add>, %39, %cst_12 [1] : vector<32x28xf32> to vector<32xf32>
    %41 = vector.shape_cast %40 : vector<32xf32> to vector<32x1xf32>
    %cst_13 = arith.constant 2.400000e+01 : f32
    %42 = vector.broadcast %cst_13 : f32 to vector<32x1xf32>
    %43 = arith.divf %41, %42 : vector<32x1xf32>
    %44 = arith.mulf %38, %38 : vector<32x1xf32>
    %45 = arith.subf %43, %44 : vector<32x1xf32>
    %cst_14 = arith.constant 0.000000e+00 : f32
    %46 = vector.broadcast %cst_14 : f32 to vector<32x1xf32>
    %47 = arith.maximumf %45, %46 : vector<32x1xf32>
    %cst_15 = arith.constant 9.99999974E-6 : f32
    %48 = vector.broadcast %cst_15 : f32 to vector<32x1xf32>
    %49 = arith.addf %47, %48 : vector<32x1xf32>
    %50 = math.rsqrt %49 : vector<32x1xf32>
    %51 = arith.mulf %1, %50 : vector<32x1xf32>
    %52 = vector.broadcast %51 : vector<32x1xf32> to vector<32x28xf32>
    %53 = arith.mulf %34, %52 : vector<32x28xf32>
    %54 = arith.mulf %38, %51 : vector<32x1xf32>
    %55 = arith.subf %2, %54 : vector<32x1xf32>
    %56 = vector.broadcast %55 : vector<32x1xf32> to vector<32x28xf32>
    %57 = arith.addf %53, %56 : vector<32x28xf32>
    %cst_16 = arith.constant 0.000000e+00 : f32
    %58 = vector.broadcast %cst_16 : f32 to vector<32x28xf32>
    %59 = arith.maximumf %57, %58 : vector<32x28xf32>
    %60 = vector.extract_strided_slice %59 {offsets = [0, 0], sizes = [32, 26], strides = [1, 1]} : vector<32x28xf32> to vector<32x26xf32>
    %61 = vector.extract_strided_slice %59 {offsets = [0, 1], sizes = [32, 26], strides = [1, 1]} : vector<32x28xf32> to vector<32x26xf32>
    %62 = vector.extract_strided_slice %59 {offsets = [0, 2], sizes = [32, 26], strides = [1, 1]} : vector<32x28xf32> to vector<32x26xf32>
    %63 = tpu.concatenate %60, %61, %62 in 0 : vector<32x26xf32>, vector<32x26xf32>, vector<32x26xf32> -> vector<96x26xf32>
    %c0_17 = arith.constant 0 : index
    %c0_18 = arith.constant 0 : index
    %64 = vector.load %arg4[%c0_17, %c0_18] : memref<40x96xf32, #tpu.memory_space<vmem>>, vector<40x96xf32>
    %cst_19 = arith.constant dense<0.000000e+00> : vector<40x26xf32>
    %65 = tpu.matmul %64, %63, %cst_19 {dimension_numbers = #tpu.dot_dimension_numbers<[1], [0], [0], [1], [0, 0, 1, 1], [], []>} : vector<40x96xf32>, vector<96x26xf32>, vector<40x26xf32> -> vector<40x26xf32>
    %66 = tpu.iota {dimensions = array<i32: 1>} : vector<1x26xi32>
    %c16_i32_20 = arith.constant 16 : i32
    %67 = vector.broadcast %c16_i32_20 : i32 to vector<1x26xi32>
    %68 = arith.remsi %66, %67 : vector<1x26xi32>
    %c10_i32 = arith.constant 10 : i32
    %69 = vector.broadcast %c10_i32 : i32 to vector<1x26xi32>
    %70 = arith.cmpi slt, %68, %69 : vector<1x26xi32>
    %cst_21 = arith.constant 0.000000e+00 : f32
    %71 = vector.shape_cast %70 : vector<1x26xi1> to vector<1x26xi1>
    %72 = vector.broadcast %71 : vector<1x26xi1> to vector<40x26xi1>
    %73 = vector.broadcast %cst_21 : f32 to vector<40x26xf32>
    %74 = arith.select %72, %65, %73 : vector<40x26xi1>, vector<40x26xf32>
    %cst_22 = arith.constant dense<0.000000e+00> : vector<40xf32>
    %75 = vector.multi_reduction <add>, %74, %cst_22 [1] : vector<40x26xf32> to vector<40xf32>
    %76 = vector.shape_cast %75 : vector<40xf32> to vector<40x1xf32>
    %cst_23 = arith.constant 2.000000e+01 : f32
    %77 = vector.broadcast %cst_23 : f32 to vector<40x1xf32>
    %78 = arith.divf %76, %77 : vector<40x1xf32>
    %79 = arith.mulf %74, %74 : vector<40x26xf32>
    %cst_24 = arith.constant dense<0.000000e+00> : vector<40xf32>
    %80 = vector.multi_reduction <add>, %79, %cst_24 [1] : vector<40x26xf32> to vector<40xf32>
    %81 = vector.shape_cast %80 : vector<40xf32> to vector<40x1xf32>
    %cst_25 = arith.constant 2.000000e+01 : f32
    %82 = vector.broadcast %cst_25 : f32 to vector<40x1xf32>
    %83 = arith.divf %81, %82 : vector<40x1xf32>
    %84 = arith.mulf %78, %78 : vector<40x1xf32>
    %85 = arith.subf %83, %84 : vector<40x1xf32>
    %cst_26 = arith.constant 0.000000e+00 : f32
    %86 = vector.broadcast %cst_26 : f32 to vector<40x1xf32>
    %87 = arith.maximumf %85, %86 : vector<40x1xf32>
    %cst_27 = arith.constant 9.99999974E-6 : f32
    %88 = vector.broadcast %cst_27 : f32 to vector<40x1xf32>
    %89 = arith.addf %87, %88 : vector<40x1xf32>
    %90 = math.rsqrt %89 : vector<40x1xf32>
    %91 = arith.mulf %3, %90 : vector<40x1xf32>
    %92 = vector.broadcast %91 : vector<40x1xf32> to vector<40x26xf32>
    %93 = arith.mulf %74, %92 : vector<40x26xf32>
    %94 = arith.mulf %78, %91 : vector<40x1xf32>
    %95 = arith.subf %4, %94 : vector<40x1xf32>
    %96 = vector.broadcast %95 : vector<40x1xf32> to vector<40x26xf32>
    %97 = arith.addf %93, %96 : vector<40x26xf32>
    %cst_28 = arith.constant 0.000000e+00 : f32
    %98 = vector.broadcast %cst_28 : f32 to vector<40x26xf32>
    %99 = arith.maximumf %97, %98 : vector<40x26xf32>
    %100 = vector.extract_strided_slice %99 {offsets = [0, 0], sizes = [40, 10], strides = [1, 1]} : vector<40x26xf32> to vector<40x10xf32>
    %c0_29 = arith.constant 0 : index
    %c0_30 = arith.constant 0 : index
    %c0_31 = arith.constant 0 : index
    %101 = vector.load %arg6[%c0_29, %c0_30, %c0_31] : memref<2x40x10xf32, #tpu.memory_space<vmem>>, vector<1x40x10xf32>
    %102 = vector.shape_cast %101 : vector<1x40x10xf32> to vector<40x10xf32>
    %103 = vector.shape_cast %100 : vector<40x10xf32> to vector<1x40x10xf32>
    tpu.vector_store %arg6[%c0_29, %c0_30, %c0_31], %103 {strides = array<i32>} : memref<2x40x10xf32, #tpu.memory_space<vmem>>, vector<1x40x10xf32>,
    %104 = vector.extract_strided_slice %99 {offsets = [0, 16], sizes = [40, 10], strides = [1, 1]} : vector<40x26xf32> to vector<40x10xf32>
    %c1 = arith.constant 1 : index
    %c0_32 = arith.constant 0 : index
    %c0_33 = arith.constant 0 : index
    %105 = vector.load %arg6[%c1, %c0_32, %c0_33] : memref<2x40x10xf32, #tpu.memory_space<vmem>>, vector<1x40x10xf32>
    %106 = vector.shape_cast %105 : vector<1x40x10xf32> to vector<40x10xf32>
    %107 = vector.shape_cast %104 : vector<40x10xf32> to vector<1x40x10xf32>
    tpu.vector_store %arg6[%c1, %c0_32, %c0_33], %107 {strides = array<i32>} : memref<2x40x10xf32, #tpu.memory_space<vmem>>, vector<1x40x10xf32>,
    return
  }
}

module attributes {stable_mosaic.version = 11 : i64} {
  func.func @head_kernel(%arg0: memref<20x40xf32, #tpu.memory_space<vmem>>, %arg1: memref<40x40xf32, #tpu.memory_space<vmem>>, %arg2: memref<4x40xf32, #tpu.memory_space<vmem>>, %arg3: memref<20x40xf32, #tpu.memory_space<vmem>>, %arg4: memref<20x1xf32, #tpu.memory_space<vmem>>) attributes {dimension_semantics = [], scalar_prefetch = 0 : i64, scratch_operands = 0 : i64, tpu.core_type = #tpu.core_type<tc>} {
    %c0 = arith.constant 0 : index
    %c0_0 = arith.constant 0 : index
    %0 = vector.load %arg2[%c0, %c0_0] : memref<4x40xf32, #tpu.memory_space<vmem>>, vector<4x40xf32>
    %1 = vector.extract_strided_slice %0 {offsets = [0, 0], sizes = [1, 40], strides = [1, 1]} : vector<4x40xf32> to vector<1x40xf32>
    %2 = vector.extract_strided_slice %0 {offsets = [1, 0], sizes = [1, 40], strides = [1, 1]} : vector<4x40xf32> to vector<1x40xf32>
    %3 = vector.extract_strided_slice %0 {offsets = [2, 0], sizes = [1, 40], strides = [1, 1]} : vector<4x40xf32> to vector<1x40xf32>
    %4 = vector.extract_strided_slice %0 {offsets = [3, 0], sizes = [1, 1], strides = [1, 1]} : vector<4x40xf32> to vector<1x1xf32>
    %c0_1 = arith.constant 0 : index
    %c0_2 = arith.constant 0 : index
    %5 = vector.load %arg0[%c0_1, %c0_2] : memref<20x40xf32, #tpu.memory_space<vmem>>, vector<20x40xf32>
    %c0_3 = arith.constant 0 : index
    %c0_4 = arith.constant 0 : index
    %6 = vector.load %arg1[%c0_3, %c0_4] : memref<40x40xf32, #tpu.memory_space<vmem>>, vector<40x40xf32>
    %cst = arith.constant dense<0.000000e+00> : vector<20x40xf32>
    %7 = tpu.matmul %5, %6, %cst {dimension_numbers = #tpu.dot_dimension_numbers<[1], [0], [0], [1], [0, 0, 1, 1], [], []>} : vector<20x40xf32>, vector<40x40xf32>, vector<20x40xf32> -> vector<20x40xf32>
    %cst_5 = arith.constant dense<0.000000e+00> : vector<40xf32>
    %8 = vector.multi_reduction <add>, %7, %cst_5 [0] : vector<20x40xf32> to vector<40xf32>
    %9 = vector.shape_cast %8 : vector<40xf32> to vector<1x40xf32>
    %cst_6 = arith.constant 5.000000e-02 : f32
    %10 = vector.broadcast %cst_6 : f32 to vector<1x40xf32>
    %11 = arith.mulf %9, %10 : vector<1x40xf32>
    %12 = arith.mulf %7, %7 : vector<20x40xf32>
    %cst_7 = arith.constant dense<0.000000e+00> : vector<40xf32>
    %13 = vector.multi_reduction <add>, %12, %cst_7 [0] : vector<20x40xf32> to vector<40xf32>
    %14 = vector.shape_cast %13 : vector<40xf32> to vector<1x40xf32>
    %cst_8 = arith.constant 5.000000e-02 : f32
    %15 = vector.broadcast %cst_8 : f32 to vector<1x40xf32>
    %16 = arith.mulf %14, %15 : vector<1x40xf32>
    %17 = arith.mulf %11, %11 : vector<1x40xf32>
    %18 = arith.subf %16, %17 : vector<1x40xf32>
    %cst_9 = arith.constant 0.000000e+00 : f32
    %19 = vector.broadcast %cst_9 : f32 to vector<1x40xf32>
    %20 = arith.maximumf %18, %19 : vector<1x40xf32>
    %cst_10 = arith.constant 9.99999974E-6 : f32
    %21 = vector.broadcast %cst_10 : f32 to vector<1x40xf32>
    %22 = arith.addf %20, %21 : vector<1x40xf32>
    %23 = math.rsqrt %22 : vector<1x40xf32>
    %24 = arith.mulf %1, %23 : vector<1x40xf32>
    %25 = vector.broadcast %11 : vector<1x40xf32> to vector<20x40xf32>
    %26 = arith.subf %7, %25 : vector<20x40xf32>
    %27 = vector.broadcast %24 : vector<1x40xf32> to vector<20x40xf32>
    %28 = arith.mulf %26, %27 : vector<20x40xf32>
    %29 = vector.broadcast %2 : vector<1x40xf32> to vector<20x40xf32>
    %30 = arith.addf %28, %29 : vector<20x40xf32>
    %c0_11 = arith.constant 0 : index
    %c0_12 = arith.constant 0 : index
    %31 = vector.load %arg3[%c0_11, %c0_12] : memref<20x40xf32, #tpu.memory_space<vmem>>, vector<20x40xf32>
    tpu.vector_store %arg3[%c0_11, %c0_12], %30 {strides = array<i32>} : memref<20x40xf32, #tpu.memory_space<vmem>>, vector<20x40xf32>,
    %32 = vector.broadcast %3 : vector<1x40xf32> to vector<20x40xf32>
    %33 = arith.mulf %30, %32 : vector<20x40xf32>
    %cst_13 = arith.constant dense<0.000000e+00> : vector<20xf32>
    %34 = vector.multi_reduction <add>, %33, %cst_13 [1] : vector<20x40xf32> to vector<20xf32>
    %35 = vector.shape_cast %34 : vector<20xf32> to vector<20x1xf32>
    %36 = vector.broadcast %4 : vector<1x1xf32> to vector<20x1xf32>
    %37 = arith.addf %35, %36 : vector<20x1xf32>
    %c0_14 = arith.constant 0 : index
    %c0_15 = arith.constant 0 : index
    %38 = vector.load %arg4[%c0_14, %c0_15] : memref<20x1xf32, #tpu.memory_space<vmem>>, vector<20x1xf32>
    tpu.vector_store %arg4[%c0_14, %c0_15], %37 {strides = array<i32>} : memref<20x1xf32, #tpu.memory_space<vmem>>, vector<20x1xf32>,
    return
  }
}

</mosaic_0001>

<bundles_post_ra>
// kernel: traj_model_forward.3
= control target key start
LH: loop header
LB: loop body
LE: loop exit
PB: predicated region body
PF: predicated region fallthrough
CT: control target
= control target key end

     0   :  { %v292_v3 = vmov 0.0|0.0   ;;  %vm293_vm0 = vmmov 0   ;;  %v294_v6 = vmov 0.0   ;;  %s389_s0 = inlined_call_operand.vmem [shape: f32[20,40], index: 0, kind: input, shape index: {}]   ;;  %s390_s1 = inlined_call_operand.vmem [shape: f32[40,40], index: 1, kind: input, shape index: {}]   ;;  %s391_s2 = inlined_call_operand.vmem [shape: f32[4,40], index: 2, kind: input, shape index: {}]   ;;  %s392_s3 = inlined_call_operand.hbm [shape: f32[20,40], index: 3, kind: output, shape index: {0}]   ;;  %s393_s4 = inlined_call_operand.vmem [shape: f32[20,1], index: 4, kind: output, shape index: {1}]  }
   0x1   :  { %v21_v0 = vld [vmem:[%s390_s1] sm:$0xff]  ;;  %v22_v1 = vld [vmem:[%s390_s1 + $0x8] sm:$0xff]  ;;  %v23_v2 = vld [vmem:[%s390_s1 + $0x10] sm:$0xff]  ;;  %248 = vmatprep.subr.bf16.mxu0 %v292_v3  ;;  %254 = vmatprep.subr.bf16.mxu1 %v292_v3 }
   0x2   :  { %v249_v4 = vpack.c.bf16 %v22_v1, %v21_v0  ;;  %v24_v5 = vld [vmem:[%s390_s1 + $0x18] sm:$0xff]  ;;  %239 = vmatprep.mubr.msk.f32.mxu0 %vm293_vm0, %v294_v6  ;;  %242 = vmatprep.mubr.msk.f32.mxu1 %vm293_vm0, %v294_v6 }
   0x3   :  { %10 = vsyncpa [#allocation3], 0  ;;  %v252_v7 = vpack.c.bf16 %v24_v5, %v23_v2  ;;  %v25_v8 = vld [vmem:[%s390_s1 + $0x20] sm:$0xff]  ;;  %vm26_vm1 = vcmask 326656   ;;  %v19_v10 = vld [vmem:[%s389_s0 + $0x8] sm:$0xff]  ;;  %vm119_vm2 = vcmask 322560   ;;  %v153_v52 = vlaneseq }
   0x4   :  { %250 = vmatpush3.bf16.msra.mxu0 %v249_v4  ;;  %257 = vmatpush3.bf16.msra.mxu1 %v249_v4  ;;  %v18_v9 = vld [vmem:[%s389_s0] sm:$0xff]  ;;  %v20_v11 = vld [vmem:[%s389_s0 + $0x10] sm:$0xf] }
   0x5   :  { %251 = vmatprep.subr.bf16.mxu0 %v292_v3  ;;  %255 = vmatprep.subr.bf16.mxu1 %v292_v3  ;;  %v154_v53 = vshrl.u32 %v153_v52, 7  ;;  %v17_v54 = vld [vmem:[%s391_s2] sm:$0xf]  ;;  %s295_s2 = smov [#allocation2]  }
   0x6   :  { %s203_s5 = sshll.u32 %s295_s2, 4  ;;  %s204_s5 = int_to_ptr.vmem [resolvable:$true] %s203_s5 }
   0x7   :  { %v155_v55 = vsub.s32 0, %v154_v53  ;;  %v162_v56 = vsub.s32 1, %v154_v53  ;;  %v172_v59 = vsub.s32 2, %v154_v53  ;;  %s268_s6 = scalar_lea.vmem %s204_s5, 384  ;;  %p273_p1 = scmp.lt.s32.totalorder %s204_s5, %s204_s5 }
   0x8   :  { %253 = vmatpush3.bf16.msra.mxu0 %v252_v7  ;;  %258 = vmatpush3.bf16.msra.mxu1 %v252_v7  ;;  %p269_p0 = scmp.ne.s32.totalorder %s204_s5, %s268_s6  ;;  %p274_p2 = scmp.lt.s32.totalorder %s268_s6, %s268_s6 }
   0x9   :  { %237 = vmatprep.subr.mxu0 %v294_v6  ;;  %256 = vmatprep.subr.mxu1 %v294_v6  ;;  %v163_v61 = vrot.slane %v17_v54, %v162_v56  ;;  %v173_v63 = vrot.slane %v17_v54, %v172_v59 }
   0xa   :  { %p275_p3 = por %p274_p2, %p273_p1 }
   0xc   :  { %238 = vmatpush3.msra.mxu0 %v25_v8  ;;  %259 = vmatpush3.msra.mxu1 %v25_v8  ;;  %p276_p4 = pnand %p275_p3, %p269_p0 }
   0xd   :  { %240 = vmatmul.mubr.msk.f32.vlgmr.msra.gmra.mrb[0].mxu0 %vm26_vm1, %v18_v9  ;;  %243 = vmatmul.mubr.msk.f32.vlgmr.msra.gmra.mrb[0].mxu1 %vm26_vm1, %v19_v10 }
   0xe   :  { %245 = vmatprep.mubr.msk.f32.mxu1 %vm293_vm0, %v294_v6 }
  0x11   :  { %246 = vmatmul.mubr.msk.f32.gmra.mrb[2].mxu1 %vm26_vm1, %v20_v11 }
  0xe0   :  { %v102_v12 = vpop.f32.mrb[0].mxu0  ;;  %v107_v13 = vpop.f32.mrb[0].mxu1 }
  0xe1   :  { %v116_v14 = vsel %vm26_vm1, %v102_v12, 0.0  ;;  %v129_v15 = vmul.f32 %v102_v12, %v102_v12  ;;  %v117_v16 = vsel %vm26_vm1, %v107_v13, 0.0  ;;  %v130_v17 = vmul.f32 %v107_v13, %v107_v13  ;;  %v244_v18 = vpop.f32.mrb[1].mxu1  ;;  %v241_v19 = vpop.f32.mrb[1].mxu0 }
  0xe2   :  { %v118_v20 = vadd.f32 %v117_v16, %v116_v14 }
  0xe3   :  { %v132_v21 = vsel %vm26_vm1, %v129_v15, 0.0  ;;  %v133_v22 = vsel %vm26_vm1, %v130_v17, 0.0 }
  0xe4   :  { %v134_v23 = vadd.f32 %v133_v22, %v132_v21  ;;  %v112_v24 = vpop.f32.mrb[2].mxu1 }
  0xe5   :  { %v120_v25 = vsel %vm119_vm2, %v112_v24, 0.0  ;;  %v131_v26 = vmul.f32 %v112_v24, %v112_v24  ;;  %v247_v27 = vpop.f32.mrb[3].mxu1 }
  0xe6   :  { %v121_v28 = vadd.f32 %v120_v25, %v118_v20 }
  0xe7   :  { %v135_v29 = vsel %vm119_vm2, %v131_v26, 0.0 }
  0xe8   :  { %v122_v30 = vrot.slane %v121_v28, 4  ;;  %v136_v31 = vadd.f32 %v135_v29, %v134_v23 }
  0xea   :  { %v123_v32 = vadd.f32 %v122_v30, %v121_v28  ;;  %v137_v33 = vrot.slane %v136_v31, 4 }
  0xec   :  { %v124_v34 = vrot.slane %v123_v32, 2  ;;  %v138_v35 = vadd.f32 %v137_v33, %v136_v31 }
  0xee   :  { %v125_v36 = vadd.f32 %v124_v34, %v123_v32  ;;  %v139_v37 = vrot.slane %v138_v35, 2 }
  0xf0   :  { %v126_v38 = vrot.slane %v125_v36, 1  ;;  %v140_v39 = vadd.f32 %v139_v37, %v138_v35 }
  0xf2   :  { %v127_v40 = vadd.f32 %v126_v38, %v125_v36  ;;  %v141_v41 = vrot.slane %v140_v39, 1 }
  0xf4   :  { %v128_v42 = vmul.f32 0.05, %v127_v40  ;;  %v142_v43 = vadd.f32 %v141_v41, %v140_v39 }
  0xf6   :  { %v143_v44 = vmul.f32 0.05, %v142_v43  ;;  %v144_v45 = vmul.f32 %v128_v42, %v128_v42  ;;  %v152_v46 = vsub.f32 %v112_v24, %v128_v42  ;;  %v150_v47 = vsub.f32 %v102_v12, %v128_v42 }
  0xf7   :  { %v151_v48 = vsub.f32 %v107_v13, %v128_v42 }
  0xf8   :  { %v145_v49 = vsub.f32 %v143_v44, %v144_v45 }
  0xfa   :  { %v146_v50 = vmax.f32 %v145_v49, 0.0 }
  0xfc   :  { %v147_v51 = vadd.f32 1e-05, %v146_v50 }
  0xfe   :  { %266 = vrsqrt.f32 %v147_v51 }
 0x108   :  { %v267_v57 = vpop.eup %266 }
 0x109   :  { %v149_v58 = vmul.f32 %v267_v57, %v17_v54 }
 0x10b   :  { %v156_v60 = vrot.slane %v149_v58, %v155_v55 }
 0x10d   :  { %v159_v62 = vmul.f32 %v156_v60, %v152_v46  ;;  %v157_v0 = vmul.f32 %v156_v60, %v150_v47  ;;  %v158_v1 = vmul.f32 %v156_v60, %v151_v48 }
 0x10f   :  { %v166_v2 = vadd.f32 %v163_v61, %v159_v62  ;;  %v164_v3 = vadd.f32 %v163_v61, %v157_v0  ;;  %v165_v4 = vadd.f32 %v163_v61, %v158_v1 }
 0x111   :  { %v176_v5 = vmul.f32 %v173_v63, %v166_v2  ;;  %169 = vst.msk [vmem:[#allocation2 + $0x10] sm:$0xf] %vm119_vm2, %v166_v2  ;;  %v174_v6 = vmul.f32 %v173_v63, %v164_v3  ;;  %v175_v9 = vmul.f32 %v173_v63, %v165_v4 }
 0x112   :  { %167 = vst.msk [vmem:[#allocation2] sm:$0xff] %vm26_vm1, %v164_v3  ;;  %168 = vst.msk [vmem:[#allocation2 + $0x8] sm:$0xff] %vm26_vm1, %v165_v4 }
 0x113   :  { %v183_v7 = vsel %vm119_vm2, %v176_v5, 0.0  ;;  %v177_v8 = vsel %vm26_vm1, %v174_v6, 0.0  ;;  %v180_v10 = vsel %vm26_vm1, %v175_v9, 0.0 }
 0x114   :  { %184 = vadd.xlane.f32.xlu1 %v183_v7  ;;  %178 = vadd.xlane.f32.xlu0 %v177_v8 }
 0x118   :  { %181 = vadd.xlane.f32.xlu0 %v180_v10 }
 0x119   :  { %279 = shalt.err (!%p276_p4)
}
 0x11a   :  { %s280_s9 = scalar_lea.hbm %s392_s3, 384 }
 0x11b   :  { %p281_p5 = scmp.ne.s32.totalorder %s392_s3, %s280_s9  ;;  %p284_p6 = scmp.lt.u32.totalorder %s280_s9, %s392_s3 }
 0x11d   :  { %p286_p7 = pnand %p284_p6, %p281_p5 }
 0x11f   :  { %289 = shalt.err (!%p286_p7)
}
 0x120   :  { %s296_s14 = smov 128   ;;  %s297_s15 = smov 8   ;;  %v188_v11 = vsub.s32 3, %v154_v53  ;;  %vm196_vm3 = vcmask 3072   ;;  %vm193_vm4 = vcmask 7168  }
 0x121   :  { %209 = dma.vmem_to_hbm [thread:$0]  %s204_s5, 384, %s392_s3, [#allocation3], %s296_s14, %s296_s14, %s297_s15  }
 0x122   :  { %v189_v12 = vrot.slane %v17_v54, %v188_v11 }
 0x1a1   :  { %v185_v13 = vpop.xlane.xlu1 %184  ;;  %v179_v14 = vpop.xlane.xlu0 %178 }
 0x1a2   :  { %v192_v15 = vadd.f32 %v189_v12, %v185_v13  ;;  %v190_v16 = vadd.f32 %v189_v12, %v179_v14 }
 0x1a4   :  { %197 = vst.msk [vmem:[%s393_s4 + $0x10] sm:$0xf] %vm196_vm3, %v192_v15 }
 0x1a5   :  { %194 = vst.msk [vmem:[%s393_s4] sm:$0xff] %vm193_vm4, %v190_v16  ;;  %v182_v17 = vpop.xlane.xlu0 %181 }
 0x1a6   :  { %v191_v18 = vadd.f32 %v189_v12, %v182_v17 }
 0x1a8   :  { %195 = vst.msk [vmem:[%s393_s4 + $0x8] sm:$0xff] %vm193_vm4, %v191_v18 }
 0x1a9   :  { %290 = dma.done.wait [#allocation3], 384  }
 0x1aa   :  { %291 = vsyncadd [#allocation3], 4294966912 }
 0x1ab   :  { %217 = vsyncpa [#allocation3], 1 }

// kernel: traj_model_forward.2
= control target key start
LH: loop header
LB: loop body
LE: loop exit
PB: predicated region body
PF: predicated region fallthrough
CT: control target
= control target key end

     0   :  { %v32_v0 = vlaneseq  ;;  %s923_s27 = smov 125   ;;  %s924_s28 = smov 127   ;;  %vm108_vm0 = vcmask 121856   ;;  %vm84_vm1 = vcmask 1040384   ;;  %vm86_vm2 = vcmask 1041408   ;;  %s1236_s0 = inlined_call_operand.vmem [shape: f32[1,32], index: 0, kind: input, shape index: {}]   ;;  %s1237_s1 = inlined_call_operand.vmem [shape: f32[1,32], index: 1, kind: input, shape index: {}]   ;;  %s1238_s2 = inlined_call_operand.vmem [shape: f32[1,32], index: 2, kind: input, shape index: {}]   ;;  %s1239_s3 = inlined_call_operand.vmem [shape: f32[32,15], index: 3, kind: input, shape index: {}]   ;;  %s1240_s5 = inlined_call_operand.vmem [shape: f32[40,4], index: 5, kind: input, shape index: {}]   ;;  %s1241_s4 = inlined_call_operand.vmem [shape: f32[40,96], index: 4, kind: input, shape index: {}]   ;;  %s1242_s6 = inlined_call_operand.vmem [shape: f32[2,40,10], index: 6, kind: output, shape index: {}]  }
   0x1   :  { %v28_v2 = vld [vmem:[%s1236_s0] sm:$0x1]  ;;  %s925_s29 = smov 124   ;;  %s926_s0 = smov 126   ;;  %vm88_vm3 = vcmask 1042432   ;;  %vm90_vm4 = vcmask 1043456  }
   0x2   :  { %v33_v1 = vshrl.u32 %v32_v0, 7  ;;  %v718_v4 = vld [vmem:[%s1237_s1] ss:$0 sm:$0xff]  ;;  %vm92_vm5 = vcmask 1044480   ;;  %vm94_vm6 = vcmask 1045504   ;;  %vm96_vm7 = vcmask 1046528  }
   0x3   :  { %v719_v5 = vld [vmem:[%s1238_s2] ss:$0 sm:$0xff]  ;;  %vm927_vm8 = vmmov 1   ;;  %v105_v40 = vld [vmem:[%s1239_s3 + $0x8] sm:$0xff]  ;;  %v106_v41 = vld [vmem:[%s1239_s3 + $0x10] sm:$0xff]  ;;  %v1007_v43 = vand.u32 127, %v32_v0 }
   0x4   :  { %v34_v3 = vsub.s32 0, %v33_v1  ;;  %v104_v9 = vld [vmem:[%s1239_s3] sm:$0xff]  ;;  %vm808_vm9 = vmpackc.low %vm96_vm7, %vm927_vm8  ;;  %v107_v42 = vld [vmem:[%s1239_s3 + $0x18] sm:$0xff]  ;;  %vm225_vm11 = vcmask 228352   ;;  %s929_s17 = smov 1   ;;  %vm932_vm12 = vmmov 0  }
   0x5   :  { %762 = vmatprep.mubr.msk.f32.mxu0 %vm108_vm0, %v104_v9  ;;  %v215_v44 = vand.u32 15, %v1007_v43  ;;  %vm396_vm13 = vcmask 785408   ;;  %vm510_vm15 = vcmask 211968   ;;  %s936_s1 = smov 112  }
   0x6   :  { %v35_v6 = vrot.slane %v28_v2, %v34_v3 }
   0x7   :  { %vm1012_vm10 = vcmp.lt.s32.totalorder %v215_v44, 12  ;;  %vm1126_vm14 = vcmp.lt.s32.totalorder %v215_v44, 10 }
   0x8   :  { %v867_v7 = vpack.i.bf16 %v35_v6, %v718_v4  ;;  %v857_v8 = vpack.i.bf16 %v719_v5, %v35_v6 }
   0xa   :  { %868 = vrot.lane.b32.xlu1 %v867_v7, %s923_s27  ;;  %858 = vrot.lane.b32.xlu0 %v857_v8, %s924_s28 }
   0xe   :  { %873 = vrot.lane.b32.xlu1 %v867_v7, %s925_s29  ;;  %863 = vrot.lane.b32.xlu0 %v857_v8, %s926_s0 }
  0x12   :  { %78 = vrot.lane.b32.xlu1 %v719_v5, %s923_s27  ;;  %54 = vrot.lane.b32.xlu0 %v718_v4, %s924_s28 }
  0x16   :  { %81 = vrot.lane.b32.xlu1 %v719_v5, %s925_s29  ;;  %57 = vrot.lane.b32.xlu0 %v718_v4, %s926_s0 }
  0x7c   :  { %v869_v10 = vpop.permute.xlu1 %868  ;;  %v859_v11 = vpop.permute.xlu0 %858 }
  0x7d   :  { %v860_v12 = vunpack.i.l.bf16 %v859_v11  ;;  %v870_v15 = vunpack.i.l.bf16 %v869_v10  ;;  %v871_v18 = vunpack.i.h.bf16 %v869_v10  ;;  %v861_v20 = vunpack.i.h.bf16 %v859_v11 }
  0x7f   :  { %v85_v19 = vsel %vm84_vm1, %v28_v2, %v860_v12  ;;  %v928_v2 = vmov 0  }
  0x80   :  { %v874_v13 = vpop.permute.xlu1 %873  ;;  %v864_v14 = vpop.permute.xlu0 %863  ;;  %877 = vset.pattern.permute.xlu0 %v928_v2  ;;  %878 = vset.pattern.permute.xlu1 %v928_v2  ;;  %v931_v2 = vmov 0.0|0.0  }
  0x81   :  { %v875_v16 = vunpack.i.l.bf16 %v874_v13  ;;  %v865_v17 = vunpack.i.l.bf16 %v864_v14  ;;  %v876_v21 = vunpack.i.h.bf16 %v874_v13  ;;  %v866_v24 = vunpack.i.h.bf16 %v864_v14  ;;  %831 = vmatprep.subr.bf16.mxu1 %v931_v2 }
  0x83   :  { %v98_v22 = vsel %vm84_vm1, %v870_v15, %v875_v16  ;;  %v87_v23 = vsel %vm86_vm2, %v85_v19, %v865_v17 }
  0x84   :  { %v79_v25 = vpop.permute.xlu1 %78  ;;  %v99_v26 = vsel %vm86_vm2, %v98_v22, %v719_v5  ;;  %v55_v27 = vpop.permute.xlu0 %54  ;;  %v89_v28 = vsel %vm88_vm3, %v87_v23, %v871_v18 }
  0x85   :  { %v100_v29 = vsel %vm88_vm3, %v99_v26, %v861_v20  ;;  %v91_v30 = vsel %vm90_vm4, %v89_v28, %v876_v21 }
  0x86   :  { %v101_v31 = vsel %vm90_vm4, %v100_v29, %v866_v24  ;;  %v93_v32 = vsel %vm92_vm5, %v91_v30, %v718_v4 }
  0x87   :  { %v102_v33 = vsel %vm92_vm5, %v101_v31, %v79_v25  ;;  %v95_v34 = vsel %vm94_vm6, %v93_v32, %v55_v27 }
  0x88   :  { %v82_v35 = vpop.permute.xlu1 %81  ;;  %v58_v36 = vpop.permute.xlu0 %57 }
  0x89   :  { %v103_v37 = vsel %vm94_vm6, %v102_v33, %v82_v35  ;;  %v97_v38 = vsel %vm96_vm7, %v95_v34, %v58_v36  ;;  %v1055_v34 = vld [vmem:[%s1240_s5 + $0x8] sm:$0xff] }
  0x8a   :  { %v807_v39 = vpack.c.bf16 %v103_v37, %v97_v38  ;;  %v1061_v38 = vld [vmem:[%s1240_s5] sm:$0xff] }
  0x8c   :  { %809 = vmatprep.subr.msk.bf16.mxu0 %vm808_vm9, %v807_v39 }
  0x8d   :  { %812 = vmatpush3.bf16.msk.msra.mxu0 %vm808_vm9, %v807_v39 }
  0x8e   :  { %813 = vmatprep.subr.bf16.mxu0 %v931_v2 }
  0x90   :  { %763 = vmatmul.mubr.msk.f32.vlgmr.msra.gmra.mrb[0].mxu0 %vm108_vm0, %v105_v40 }
  0x91   :  { %765 = vmatprep.mubr.msk.f32.mxu0 %vm108_vm0, %v106_v41  ;;  %v1066_v41 = vld [vmem:[%s1240_s5 + $0x10] sm:$0xff] }
  0x94   :  { %766 = vmatmul.mubr.msk.f32.gmra.mrb[2].mxu0 %vm108_vm0, %v107_v42  ;;  %vm682_vm0 = vcmask 80896  }
 0x163   :  { %v764_v46 = vpop.f32.mrb[0].mxu0 }
 0x164   :  { %v1018_v47 = vsel %vm1012_vm10, %v764_v46, 0.0  ;;  %v190_v48 = vpop.f32.mrb[1].mxu0 }
 0x165   :  { %v1022_v49 = vsel %vm1012_vm10, %v190_v48, 0.0  ;;  %v229_v50 = vsel %vm225_vm11, %v1018_v47, 0.0  ;;  %v244_v52 = vmul.f32 %v1018_v47, %v1018_v47 }
 0x166   :  { %230 = vadd.xlane.f32.xlu1 %v229_v50  ;;  %v226_v51 = vsel %vm225_vm11, %v1022_v49, 0.0  ;;  %v243_v58 = vmul.f32 %v1022_v49, %v1022_v49  ;;  %v1075_v50 = vld [vmem:[%s1240_s5 + $0x18] sm:$0xff] }
 0x167   :  { %227 = vadd.xlane.f32.xlu0 %v226_v51  ;;  %v767_v53 = vpop.f32.mrb[2].mxu0  ;;  %v250_v56 = vsel %vm225_vm11, %v244_v52, 0.0 }
 0x168   :  { %v200_v54 = vpop.f32.mrb[3].mxu0  ;;  %v247_v61 = vsel %vm225_vm11, %v243_v58, 0.0  ;;  %v1045_v62 = vsel %vm1012_vm10, %v767_v53, 0.0 }
 0x169   :  { %v1032_v55 = vsel %vm1012_vm10, %v200_v54, 0.0  ;;  %v235_v63 = vsel %vm225_vm11, %v1045_v62, 0.0  ;;  %v246_v0 = vmul.f32 %v1045_v62, %v1045_v62  ;;  %v930_v54 = vmov 1  }
 0x16a   :  { %v232_v57 = vsel %vm225_vm11, %v1032_v55, 0.0  ;;  %v245_v59 = vmul.f32 %v1032_v55, %v1032_v55 }
 0x16b   :  { %251 = vadd.xlane.f32.xlu0 %v250_v56  ;;  %233 = vadd.xlane.f32.xlu1 %v232_v57  ;;  %v256_v1 = vsel %vm225_vm11, %v246_v0, 0.0 }
 0x16c   :  { %v253_v60 = vsel %vm225_vm11, %v245_v59, 0.0 }
 0x16f   :  { %248 = vadd.xlane.f32.xlu0 %v247_v61  ;;  %254 = vadd.xlane.f32.xlu1 %v253_v60 }
 0x173   :  { %236 = vadd.xlane.f32.xlu0 %v235_v63 }
 0x177   :  { %257 = vadd.xlane.f32.xlu0 %v256_v1 }
 0x1f3   :  { %v231_v3 = vpop.xlane.xlu1 %230 }
 0x1f4   :  { %v228_v4 = vpop.xlane.xlu0 %227  ;;  %v240_v5 = vmul.f32 0.041666668, %v231_v3 }
 0x1f5   :  { %v239_v9 = vmul.f32 0.041666668, %v228_v4 }
 0x1f6   :  { %v264_v8 = vmul.f32 %v240_v5, %v240_v5 }
 0x1f7   :  { %v263_v16 = vmul.f32 %v239_v9, %v239_v9 }
 0x1f8   :  { %v252_v6 = vpop.xlane.xlu0 %251  ;;  %v234_v7 = vpop.xlane.xlu1 %233 }
 0x1f9   :  { %v260_v10 = vmul.f32 0.041666668, %v252_v6  ;;  %v241_v11 = vmul.f32 0.041666668, %v234_v7 }
 0x1fb   :  { %v268_v12 = vsub.f32 %v260_v10, %v264_v8  ;;  %v265_v13 = vmul.f32 %v241_v11, %v241_v11 }
 0x1fc   :  { %v249_v14 = vpop.xlane.xlu0 %248  ;;  %v255_v15 = vpop.xlane.xlu1 %254 }
 0x1fd   :  { %v272_v17 = vmax.f32 %v268_v12, 0.0  ;;  %v259_v18 = vmul.f32 0.041666668, %v249_v14  ;;  %v261_v19 = vmul.f32 0.041666668, %v255_v15 }
 0x1ff   :  { %v276_v20 = vadd.f32 1e-05, %v272_v17  ;;  %v267_v21 = vsub.f32 %v259_v18, %v263_v16  ;;  %v269_v22 = vsub.f32 %v261_v19, %v265_v13 }
 0x200   :  { %v237_v23 = vpop.xlane.xlu0 %236 }
 0x201   :  { %905 = vrsqrt.f32 %v276_v20  ;;  %v271_v24 = vmax.f32 %v267_v21, 0.0  ;;  %v273_v25 = vmax.f32 %v269_v22, 0.0  ;;  %v242_v26 = vmul.f32 0.041666668, %v237_v23 }
 0x203   :  { %v275_v27 = vadd.f32 1e-05, %v271_v24  ;;  %v277_v28 = vadd.f32 1e-05, %v273_v25  ;;  %v266_v30 = vmul.f32 %v242_v26, %v242_v26 }
 0x204   :  { %v258_v29 = vpop.xlane.xlu0 %257 }
 0x205   :  { %907 = vrsqrt.f32 %v275_v27  ;;  %v262_v31 = vmul.f32 0.041666668, %v258_v29 }
 0x206   :  { %909 = vrsqrt.f32 %v277_v28 }
 0x207   :  { %v270_v32 = vsub.f32 %v262_v31, %v266_v30 }
 0x209   :  { %v274_v33 = vmax.f32 %v270_v32, 0.0 }
 0x20b   :  { %v906_v35 = vpop.eup %905  ;;  %v278_v36 = vadd.f32 1e-05, %v274_v33 }
 0x20c   :  { %v284_v37 = vmul.f32 %v906_v35, %v1055_v34 }
 0x20d   :  { %911 = vrsqrt.f32 %v278_v36 }
 0x20e   :  { %v312_v39 = vmul.f32 %v284_v37, %v240_v5 }
 0x20f   :  { %v908_v40 = vpop.eup %907 }
 0x210   :  { %v910_v42 = vpop.eup %909  ;;  %321 = vrot.lane.b32.xlu0 %v312_v39, %s929_s17  ;;  %v283_v45 = vmul.f32 %v908_v40, %v1061_v38 }
 0x211   :  { %v285_v48 = vmul.f32 %v910_v42, %v1066_v41 }
 0x212   :  { %v311_v46 = vmul.f32 %v283_v45, %v239_v9 }
 0x213   :  { %v313_v51 = vmul.f32 %v285_v48, %v241_v11 }
 0x214   :  { %289 = vperm.xlu0 %877, %v283_v45   ;;  %319 = vrot.lane.b32.xlu1 %v311_v46, %s929_s17  ;;  %v391_v45 = vld [vmem:[%s1241_s4] sm:$0xff]  ;;  %v393_v46 = vld [vmem:[%s1241_s4 + $0x10] sm:$0xff] }
 0x217   :  { %v912_v52 = vpop.eup %911 }
 0x218   :  { %323 = vrot.lane.b32.xlu1 %v313_v51, %s929_s17  ;;  %v286_v53 = vmul.f32 %v912_v52, %v1075_v50  ;;  %879 = vset.pattern.permute.xlu0 %v930_v54  ;;  %v394_v51 = vld [vmem:[%s1241_s4 + $0x18] sm:$0xff]  ;;  %v395_v52 = vld [vmem:[%s1241_s4 + $0x20] sm:$0xff] }
 0x21a   :  { %v314_v56 = vmul.f32 %v286_v53, %v242_v26 }
 0x21c   :  { %325 = vrot.lane.b32.xlu1 %v314_v56, %s929_s17 }
 0x220   :  { %294 = vperm.xlu1 %878, %v284_v37  }
 0x224   :  { %299 = vperm.xlu1 %878, %v285_v48   ;;  %v392_v48 = vld [vmem:[%s1241_s4 + $0x8] sm:$0xff] }
 0x228   :  { %304 = vperm.xlu1 %878, %v286_v53  }
 0x22c   :  { %880 = vset.pattern.permute.xlu1 %v930_v54 }
 0x282   :  { %v322_v57 = vpop.permute.xlu0 %321 }
 0x283   :  { %v332_v58 = vsub.f32 %v1055_v34, %v322_v57 }
 0x285   :  { %342 = vperm.xlu0 %879, %v332_v58  }
 0x286   :  { %v320_v59 = vpop.permute.xlu1 %319 }
 0x287   :  { %v331_v60 = vsub.f32 %v1061_v38, %v320_v59 }
 0x289   :  { %337 = vperm.xlu1 %880, %v331_v60  }
 0x28a   :  { %v324_v61 = vpop.permute.xlu1 %323 }
 0x28b   :  { %v333_v63 = vsub.f32 %v1066_v41, %v324_v61 }
 0x28d   :  { %347 = vperm.xlu0 %879, %v333_v63  }
 0x28e   :  { %v326_v0 = vpop.permute.xlu1 %325 }
 0x28f   :  { %v334_v1 = vsub.f32 %v1075_v50, %v326_v0 }
 0x291   :  { %352 = vperm.xlu1 %880, %v334_v1  }
 0x293   :  { %v290_v5 = vpop.permute.xlu0 %289 }
 0x294   :  { %v307_v9 = vmul.f32 %v290_v5, %v1022_v49 }
 0x29f   :  { %v295_v3 = vpop.permute.xlu1 %294 }
 0x2a0   :  { %v308_v8 = vmul.f32 %v295_v3, %v1018_v47 }
 0x2a3   :  { %v300_v4 = vpop.permute.xlu1 %299 }
 0x2a4   :  { %v309_v16 = vmul.f32 %v300_v4, %v1032_v55 }
 0x2a7   :  { %v305_v6 = vpop.permute.xlu1 %304 }
 0x2a8   :  { %v310_v19 = vmul.f32 %v305_v6, %v1045_v62  ;;  %v933_v62 = vmov 0.0  }
 0x2a9   :  { %792 = vmatprep.mubr.msk.f32.mxu0 %vm932_vm12, %v933_v62  ;;  %798 = vmatprep.mubr.msk.f32.mxu1 %vm932_vm12, %v933_v62 }
 0x304   :  { %v343_v7 = vpop.permute.xlu0 %342 }
 0x305   :  { %v356_v10 = vadd.f32 %v343_v7, %v308_v8 }
 0x307   :  { %v360_v13 = vmax.f32 %v356_v10, 0.0 }
 0x308   :  { %v338_v11 = vpop.permute.xlu1 %337 }
 0x309   :  { %v355_v12 = vadd.f32 %v338_v11, %v307_v9 }
 0x30b   :  { %v359_v14 = vmax.f32 %v355_v12, 0.0 }
 0x30c   :  { %v348_v15 = vpop.permute.xlu0 %347 }
 0x30d   :  { %v814_v17 = vpack.c.bf16 %v360_v13, %v359_v14  ;;  %v881_v18 = vpack.i.bf16 %v360_v13, %v359_v14  ;;  %v357_v20 = vadd.f32 %v348_v15, %v309_v16 }
 0x30f   :  { %882 = vrot.lane.b32.xlu0 %v881_v18, %s924_s28  ;;  %815 = vmatpush3.bf16.msra.mxu0 %v814_v17  ;;  %v361_v21 = vmax.f32 %v357_v20, 0.0  ;;  %v934_v20 = vmov 2  }
 0x310   :  { %837 = vmatpush3.bf16.msra.mxu1 %v814_v17  ;;  %v353_v47 = vpop.permute.xlu1 %352  ;;  %816 = vmatprep.subr.bf16.mxu0 %v931_v2 }
 0x311   :  { %v358_v49 = vadd.f32 %v353_v47, %v310_v19  ;;  %832 = vmatprep.subr.bf16.mxu1 %v931_v2  ;;  %901 = vset.pattern.permute.xlu1 %v934_v20 }
 0x312   :  { %902 = vset.pattern.permute.xlu0 %v934_v20 }
 0x313   :  { %v362_v22 = vmax.f32 %v358_v49, 0.0  ;;  %892 = vrot.lane.b32.xlu0 %v881_v18, %s926_s0 }
 0x315   :  { %v817_v55 = vpack.c.bf16 %v362_v22, %v361_v21  ;;  %v886_v23 = vpack.i.bf16 %v362_v22, %v361_v21 }
 0x317   :  { %887 = vrot.lane.b32.xlu1 %v886_v23, %s924_s28  ;;  %818 = vmatpush3.bf16.msra.mxu0 %v817_v55 }
 0x318   :  { %838 = vmatpush3.bf16.msra.mxu1 %v817_v55  ;;  %819 = vmatprep.subr.bf16.mxu0 %v931_v2 }
 0x319   :  { %833 = vmatprep.subr.bf16.mxu1 %v931_v2 }
 0x31b   :  { %897 = vrot.lane.b32.xlu1 %v886_v23, %s926_s0 }
 0x381   :  { %v883_v24 = vpop.permute.xlu0 %882 }
 0x382   :  { %v885_v25 = vunpack.i.h.bf16 %v883_v24  ;;  %v884_v26 = vunpack.i.l.bf16 %v883_v24 }
 0x384   :  { %v820_v27 = vpack.c.bf16 %v885_v25, %v884_v26 }
 0x385   :  { %v893_v28 = vpop.permute.xlu0 %892 }
 0x386   :  { %821 = vmatpush3.bf16.msra.mxu0 %v820_v27  ;;  %839 = vmatpush3.bf16.msra.mxu1 %v820_v27  ;;  %v895_v32 = vunpack.i.h.bf16 %v893_v28  ;;  %v894_v33 = vunpack.i.l.bf16 %v893_v28 }
 0x387   :  { %822 = vmatprep.subr.bf16.mxu0 %v931_v2  ;;  %834 = vmatprep.subr.bf16.mxu1 %v931_v2 }
 0x388   :  { %v826_v37 = vpack.c.bf16 %v895_v32, %v894_v33 }
 0x389   :  { %v888_v29 = vpop.permute.xlu1 %887 }
 0x38a   :  { %v890_v30 = vunpack.i.h.bf16 %v888_v29  ;;  %v889_v31 = vunpack.i.l.bf16 %v888_v29 }
 0x38c   :  { %v823_v35 = vpack.c.bf16 %v890_v30, %v889_v31 }
 0x38d   :  { %v898_v36 = vpop.permute.xlu1 %897 }
 0x38e   :  { %824 = vmatpush3.bf16.msra.mxu0 %v823_v35  ;;  %840 = vmatpush3.bf16.msra.mxu1 %v823_v35  ;;  %v900_v39 = vunpack.i.h.bf16 %v898_v36  ;;  %v899_v40 = vunpack.i.l.bf16 %v898_v36 }
 0x38f   :  { %825 = vmatprep.subr.bf16.mxu0 %v931_v2  ;;  %835 = vmatprep.subr.bf16.mxu1 %v931_v2 }
 0x390   :  { %v829_v42 = vpack.c.bf16 %v900_v39, %v899_v40 }
 0x392   :  { %827 = vmatpush3.bf16.msra.mxu0 %v826_v37  ;;  %841 = vmatpush3.bf16.msra.mxu1 %v826_v37 }
 0x393   :  { %828 = vmatprep.subr.bf16.mxu0 %v931_v2  ;;  %836 = vmatprep.subr.bf16.mxu1 %v931_v2 }
 0x396   :  { %830 = vmatpush3.bf16.msra.mxu0 %v829_v42  ;;  %842 = vmatpush3.bf16.msra.mxu1 %v829_v42 }
 0x399   :  { %793 = vmatmul.mubr.msk.f32.vlgmr.msra.gmra.mrb[4].mxu0 %vm396_vm13, %v391_v45  ;;  %799 = vmatmul.mubr.msk.f32.vlgmr.msra.gmra.mrb[0].mxu1 %vm396_vm13, %v393_v46 }
 0x39a   :  { %795 = vmatprep.mubr.msk.f32.mxu0 %vm932_vm12, %v933_v62  ;;  %801 = vmatprep.mubr.msk.f32.mxu1 %vm932_vm12, %v933_v62 }
 0x39d   :  { %796 = vmatmul.mubr.msk.f32.gmra.mrb[6].mxu0 %vm396_vm13, %v392_v48  ;;  %802 = vmatmul.mubr.msk.f32.gmra.mrb[2].mxu1 %vm396_vm13, %v394_v51 }
 0x39e   :  { %804 = vmatprep.mubr.msk.f32.mxu1 %vm932_vm12, %v933_v62 }
 0x3a1   :  { %805 = vmatmul.mubr.msk.f32.gmra.mrb[4].mxu1 %vm396_vm13, %v395_v52 }
 0x46c   :  { %v478_v54 = vpop.f32.mrb[4].mxu0  ;;  %v488_v56 = vpop.f32.mrb[0].mxu1 }
 0x46d   :  { %v1132_v57 = vsel %vm1126_vm14, %v478_v54, 0.0  ;;  %v794_v58 = vpop.f32.mrb[5].mxu0  ;;  %v1136_v59 = vsel %vm1126_vm14, %v488_v56, 0.0  ;;  %v800_v60 = vpop.f32.mrb[1].mxu1 }
 0x46e   :  { %v511_v43 = vsel %vm510_vm15, %v1132_v57, 0.0  ;;  %v517_v61 = vsel %vm510_vm15, %v1136_v59, 0.0  ;;  %v532_v4 = vmul.f32 %v1132_v57, %v1132_v57  ;;  %v534_v11 = vmul.f32 %v1136_v59, %v1136_v59 }
 0x46f   :  { %512 = vadd.xlane.f32.xlu0 %v511_v43 }
 0x470   :  { %v483_v44 = vpop.f32.mrb[6].mxu0  ;;  %v493_v63 = vpop.f32.mrb[2].mxu1  ;;  %v537_v10 = vsel %vm510_vm15, %v532_v4, 0.0  ;;  %v543_v14 = vsel %vm510_vm15, %v534_v11, 0.0 }
 0x471   :  { %v1144_v0 = vsel %vm1126_vm14, %v483_v44, 0.0  ;;  %v797_v1 = vpop.f32.mrb[7].mxu0  ;;  %v803_v2 = vpop.f32.mrb[3].mxu1  ;;  %v1162_v12 = vsel %vm1126_vm14, %v493_v63, 0.0 }
 0x472   :  { %v514_v3 = vsel %vm510_vm15, %v1144_v0, 0.0  ;;  %v533_v5 = vmul.f32 %v1144_v0, %v1144_v0  ;;  %v535_v15 = vmul.f32 %v1162_v12, %v1162_v12  ;;  %v520_v16 = vsel %vm510_vm15, %v1162_v12, 0.0 }
 0x473   :  { %518 = vadd.xlane.f32.xlu0 %v517_v61  ;;  %515 = vadd.xlane.f32.xlu1 %v514_v3 }
 0x474   :  { %v540_v6 = vsel %vm510_vm15, %v533_v5, 0.0  ;;  %v498_v7 = vpop.f32.mrb[4].mxu1  ;;  %v546_v17 = vsel %vm510_vm15, %v535_v15, 0.0 }
 0x475   :  { %v1155_v8 = vsel %vm1126_vm14, %v498_v7, 0.0  ;;  %v806_v9 = vpop.f32.mrb[5].mxu1 }
 0x476   :  { %v523_v13 = vsel %vm510_vm15, %v1155_v8, 0.0  ;;  %v536_v18 = vmul.f32 %v1155_v8, %v1155_v8 }
 0x477   :  { %538 = vadd.xlane.f32.xlu0 %v537_v10  ;;  %541 = vadd.xlane.f32.xlu1 %v540_v6 }
 0x478   :  { %v549_v19 = vsel %vm510_vm15, %v536_v18, 0.0 }
 0x47b   :  { %544 = vadd.xlane.f32.xlu0 %v543_v14  ;;  %524 = vadd.xlane.f32.xlu1 %v523_v13 }
 0x47f   :  { %521 = vadd.xlane.f32.xlu0 %v520_v16  ;;  %547 = vadd.xlane.f32.xlu1 %v546_v17  ;;  %v27_v16 = vld [vmem:[%s1240_s5 + $0x20] sm:$0xff] }
 0x483   :  { %550 = vadd.xlane.f32.xlu0 %v549_v19 }
 0x4fc   :  { %v513_v47 = vpop.xlane.xlu0 %512 }
 0x4fd   :  { %v527_v22 = vmul.f32 0.05, %v513_v47 }
 0x4ff   :  { %v557_v25 = vmul.f32 %v527_v22, %v527_v22 }
 0x500   :  { %v519_v49 = vpop.xlane.xlu0 %518  ;;  %v516_v21 = vpop.xlane.xlu1 %515 }
 0x501   :  { %v528_v55 = vmul.f32 0.05, %v516_v21  ;;  %v529_v26 = vmul.f32 0.05, %v519_v49  ;;  %v935_v49 = vmov 3  }
 0x503   :  { %v558_v23 = vmul.f32 %v528_v55, %v528_v55  ;;  %v559_v33 = vmul.f32 %v529_v26, %v529_v26 }
 0x504   :  { %v539_v62 = vpop.xlane.xlu0 %538  ;;  %v542_v24 = vpop.xlane.xlu1 %541 }
 0x505   :  { %v552_v27 = vmul.f32 0.05, %v539_v62  ;;  %v553_v28 = vmul.f32 0.05, %v542_v24 }
 0x507   :  { %v562_v29 = vsub.f32 %v552_v27, %v557_v25  ;;  %v563_v30 = vsub.f32 %v553_v28, %v558_v23 }
 0x508   :  { %v545_v31 = vpop.xlane.xlu0 %544  ;;  %v525_v32 = vpop.xlane.xlu1 %524 }
 0x509   :  { %v567_v35 = vmax.f32 %v562_v29, 0.0  ;;  %v568_v36 = vmax.f32 %v563_v30, 0.0  ;;  %v554_v37 = vmul.f32 0.05, %v545_v31  ;;  %v531_v51 = vmul.f32 0.05, %v525_v32 }
 0x50b   :  { %v572_v39 = vadd.f32 1e-05, %v567_v35  ;;  %v573_v40 = vadd.f32 1e-05, %v568_v36  ;;  %v564_v42 = vsub.f32 %v554_v37, %v559_v33  ;;  %v561_v60 = vmul.f32 %v531_v51, %v531_v51 }
 0x50c   :  { %v522_v45 = vpop.xlane.xlu0 %521  ;;  %v548_v46 = vpop.xlane.xlu1 %547 }
 0x50d   :  { %913 = vrsqrt.f32 %v572_v39  ;;  %v569_v48 = vmax.f32 %v564_v42, 0.0  ;;  %v530_v52 = vmul.f32 0.05, %v522_v45  ;;  %v555_v56 = vmul.f32 0.05, %v548_v46 }
 0x50e   :  { %915 = vrsqrt.f32 %v573_v40 }
 0x50f   :  { %v574_v53 = vadd.f32 1e-05, %v569_v48  ;;  %v560_v54 = vmul.f32 %v530_v52, %v530_v52 }
 0x510   :  { %v551_v58 = vpop.xlane.xlu0 %550 }
 0x511   :  { %917 = vrsqrt.f32 %v574_v53  ;;  %v565_v43 = vsub.f32 %v555_v56, %v560_v54  ;;  %v556_v44 = vmul.f32 0.05, %v551_v58 }
 0x513   :  { %v570_v61 = vmax.f32 %v565_v43, 0.0  ;;  %v566_v63 = vsub.f32 %v556_v44, %v561_v60 }
 0x515   :  { %v575_v1 = vadd.f32 1e-05, %v570_v61  ;;  %v571_v2 = vmax.f32 %v566_v63, 0.0 }
 0x517   :  { %v914_v3 = vpop.eup %913  ;;  %919 = vrsqrt.f32 %v575_v1  ;;  %v576_v4 = vadd.f32 1e-05, %v571_v2 }
 0x518   :  { %v916_v5 = vpop.eup %915  ;;  %v582_v6 = vmul.f32 %v914_v3, %v1061_v38 }
 0x519   :  { %921 = vrsqrt.f32 %v576_v4  ;;  %v583_v7 = vmul.f32 %v916_v5, %v1055_v34 }
 0x51a   :  { %v617_v9 = vmul.f32 %v582_v6, %v527_v22 }
 0x51b   :  { %v918_v10 = vpop.eup %917  ;;  %v618_v11 = vmul.f32 %v583_v7, %v528_v55 }
 0x51c   :  { %627 = vrot.lane.b32.xlu1 %v617_v9, %s929_s17  ;;  %v584_v13 = vmul.f32 %v918_v10, %v1066_v41 }
 0x51d   :  { %629 = vrot.lane.b32.xlu0 %v618_v11, %s929_s17 }
 0x51e   :  { %v619_v14 = vmul.f32 %v584_v13, %v529_v26 }
 0x520   :  { %631 = vrot.lane.b32.xlu1 %v619_v14, %s929_s17 }
 0x521   :  { %v920_v15 = vpop.eup %919 }
 0x522   :  { %v585_v17 = vmul.f32 %v920_v15, %v1075_v50 }
 0x523   :  { %v922_v18 = vpop.eup %921 }
 0x524   :  { %v620_v19 = vmul.f32 %v585_v17, %v530_v52  ;;  %v586_v20 = vmul.f32 %v922_v18, %v27_v16 }
 0x526   :  { %633 = vrot.lane.b32.xlu1 %v620_v19, %s929_s17  ;;  %v621_v47 = vmul.f32 %v586_v20, %v531_v51 }
 0x528   :  { %635 = vrot.lane.b32.xlu0 %v621_v47, %s929_s17 }
 0x52a   :  { %589 = vperm.xlu1 %901, %v582_v6  }
 0x52c   :  { %594 = vperm.xlu0 %902, %v583_v7  }
 0x52e   :  { %599 = vperm.xlu1 %901, %v584_v13  }
 0x530   :  { %609 = vperm.xlu0 %902, %v586_v20  }
 0x532   :  { %604 = vperm.xlu1 %901, %v585_v17  }
 0x534   :  { %904 = vset.pattern.permute.xlu0 %v935_v49 }
 0x536   :  { %903 = vset.pattern.permute.xlu1 %v935_v49 }
 0x58e   :  { %v628_v21 = vpop.permute.xlu1 %627 }
 0x58f   :  { %v630_v22 = vpop.permute.xlu0 %629  ;;  %v642_v55 = vsub.f32 %v1061_v38, %v628_v21 }
 0x590   :  { %v643_v23 = vsub.f32 %v1055_v34, %v630_v22 }
 0x591   :  { %649 = vperm.xlu1 %903, %v642_v55  }
 0x592   :  { %654 = vperm.xlu0 %904, %v643_v23   ;;  %v632_v62 = vpop.permute.xlu1 %631 }
 0x593   :  { %v644_v24 = vsub.f32 %v1066_v41, %v632_v62 }
 0x595   :  { %659 = vperm.xlu1 %903, %v644_v24  }
 0x598   :  { %v634_v25 = vpop.permute.xlu1 %633 }
 0x599   :  { %v645_v26 = vsub.f32 %v1075_v50, %v634_v25 }
 0x59a   :  { %v636_v27 = vpop.permute.xlu0 %635 }
 0x59b   :  { %v646_v28 = vsub.f32 %v27_v16, %v636_v27  ;;  %664 = vperm.xlu1 %903, %v645_v26  }
 0x59d   :  { %669 = vperm.xlu0 %904, %v646_v28  }
 0x5a9   :  { %v590_v29 = vpop.permute.xlu1 %589 }
 0x5aa   :  { %v612_v34 = vmul.f32 %v590_v29, %v1132_v57 }
 0x5ab   :  { %v595_v31 = vpop.permute.xlu0 %594 }
 0x5ac   :  { %v613_v33 = vmul.f32 %v595_v31, %v1144_v0 }
 0x5ad   :  { %v600_v30 = vpop.permute.xlu1 %599 }
 0x5ae   :  { %v614_v50 = vmul.f32 %v600_v30, %v1136_v59 }
 0x5af   :  { %v610_v38 = vpop.permute.xlu0 %609 }
 0x5b0   :  { %v616_v46 = vmul.f32 %v610_v38, %v1155_v8 }
 0x5b1   :  { %v605_v32 = vpop.permute.xlu1 %604 }
 0x5b2   :  { %v615_v59 = vmul.f32 %v605_v32, %v1162_v12 }
 0x610   :  { %v650_v35 = vpop.permute.xlu1 %649 }
 0x611   :  { %v655_v36 = vpop.permute.xlu0 %654  ;;  %v672_v41 = vadd.f32 %v650_v35, %v612_v34 }
 0x612   :  { %v673_v37 = vadd.f32 %v655_v36, %v613_v33 }
 0x613   :  { %v677_v39 = vmax.f32 %v672_v41, 0.0 }
 0x614   :  { %v678_v40 = vmax.f32 %v673_v37, 0.0  ;;  %v660_v42 = vpop.permute.xlu1 %659 }
 0x615   :  { %683 = vst.msk [vmem:[%s1242_s6] sm:$0xff] %vm682_vm0, %v677_v39  ;;  %v674_v45 = vadd.f32 %v660_v42, %v614_v50  ;;  %693 = vrot.lane.b32.xlu1 %v677_v39, %s936_s1 }
 0x616   :  { %684 = vst.msk [vmem:[%s1242_s6 + $0x8] sm:$0xff] %vm682_vm0, %v678_v40  ;;  %695 = vrot.lane.b32.xlu0 %v678_v40, %s936_s1 }
 0x617   :  { %v679_v57 = vmax.f32 %v674_v45, 0.0 }
 0x619   :  { %685 = vst.msk [vmem:[%s1242_s6 + $0x10] sm:$0xff] %vm682_vm0, %v679_v57  ;;  %697 = vrot.lane.b32.xlu1 %v679_v57, %s936_s1 }
 0x61a   :  { %v665_v0 = vpop.permute.xlu1 %664 }
 0x61b   :  { %v675_v48 = vadd.f32 %v665_v0, %v615_v59 }
 0x61c   :  { %v670_v51 = vpop.permute.xlu0 %669 }
 0x61d   :  { %v680_v52 = vmax.f32 %v675_v48, 0.0  ;;  %v676_v53 = vadd.f32 %v670_v51, %v616_v46 }
 0x61f   :  { %686 = vst.msk [vmem:[%s1242_s6 + $0x18] sm:$0xff] %vm682_vm0, %v680_v52  ;;  %v681_v54 = vmax.f32 %v676_v53, 0.0  ;;  %699 = vrot.lane.b32.xlu0 %v680_v52, %s936_s1 }
 0x621   :  { %687 = vst.msk [vmem:[%s1242_s6 + $0x20] sm:$0xff] %vm682_vm0, %v681_v54  ;;  %701 = vrot.lane.b32.xlu1 %v681_v54, %s936_s1 }
 0x687   :  { %v694_v12 = vpop.permute.xlu1 %693 }
 0x688   :  { %v696_v56 = vpop.permute.xlu0 %695  ;;  %730 = vst.msk [vmem:[%s1242_s6 + $0x28] sm:$0xff] %vm682_vm0, %v694_v12 }
 0x689   :  { %731 = vst.msk [vmem:[%s1242_s6 + $0x30] sm:$0xff] %vm682_vm0, %v696_v56 }
 0x68b   :  { %v698_v8 = vpop.permute.xlu1 %697 }
 0x68c   :  { %732 = vst.msk [vmem:[%s1242_s6 + $0x38] sm:$0xff] %vm682_vm0, %v698_v8 }
 0x691   :  { %v700_v58 = vpop.permute.xlu0 %699 }
 0x692   :  { %733 = vst.msk [vmem:[%s1242_s6 + $0x40] sm:$0xff] %vm682_vm0, %v700_v58 }
 0x693   :  { %v702_v60 = vpop.permute.xlu1 %701 }
 0x694   :  { %734 = vst.msk [vmem:[%s1242_s6 + $0x48] sm:$0xff] %vm682_vm0, %v702_v60 }

</bundles_post_ra>
